<compile_context>
chip_gen: v5e
topology: v5e:2x2
jax: 0.10.0
libtpu: 0.0.40
codegen_flags: <defaults>
</compile_context>

<pallas_src>
import jax
import jax.numpy as jnp
import numpy as np
from jax.experimental import pallas as pl
from jax.experimental.pallas import tpu as pltpu

HIDDEN = 16            # create_mlp([in, 16, out]) hidden width
FOUT_PAD = 128         # lane-dense output slab width (one full vreg lane row)
_NEG = -3.0e38         # -inf surrogate used by the max reductions
_NEG_THRESH = -1.0e38  # "still the sentinel" => node had zero in-degree


# ------------------------------ fused kernel ------------------------------

def _hetero_graphconv_kernel(ne_ref,                        # SMEM (D, S) int32
                             ef_ref, si_ref, di_ref,        # per-relation edges
                             xs_ref, xd_ref,                # node features
                             mw1e_ref, mw1s_ref, mb1_ref, mw2_ref, mb2_ref,
                             uw1d_ref, uw1m_ref, ub1_ref, uw2_ref, ub2_ref,
                             out_ref):
    d = pl.program_id(0)       # destination node-type index ("parallel")
    s = pl.program_id(1)       # source node-type index (innermost, accumulated)

    @pl.when(s == 0)
    def _init():
        # Running-max accumulator for torch.max(torch.stack(alist), 0).
        out_ref[...] = jnp.full(out_ref.shape, _NEG, dtype=out_ref.dtype)

    @pl.when(ne_ref[d, s] > 0)      # skip empty / missing-input relations
    def _compute():
        E = ef_ref.shape[0]         # padded edge count
        Ns = xs_ref.shape[0]        # padded number of source nodes
        Nd = xd_ref.shape[0]        # padded number of destination nodes

        edge_h = ef_ref[...]        # (E, EF)
        src_idx = si_ref[...]       # (E, 1) int32
        dst_idx = di_ref[...]       # (E, 1) int32 (pad rows hold an OOB id)

        # ---- fc_msg: Linear on concat([edge_h, x_src[src_idx]]) -> ReLU -> Linear
        # Gather + concat folded into split matmuls; the gather is a one-hot
        # matmul so no gathered/concatenated array ever leaves VMEM.
        src_oh = (jax.lax.broadcasted_iota(jnp.int32, (E, Ns), 1) == src_idx
                  ).astype(jnp.float32)                                     # (E, Ns)
        src_proj = jnp.dot(xs_ref[...], mw1s_ref[...],
                           preferred_element_type=jnp.float32)              # (Ns, H)
        h = (jnp.dot(edge_h, mw1e_ref[...], preferred_element_type=jnp.float32)
             + jnp.dot(src_oh, src_proj, preferred_element_type=jnp.float32)
             + mb1_ref[...])                                                # (E, H)
        h = jnp.maximum(h, 0.0)
        msg = (jnp.dot(h, mw2_ref[...], preferred_element_type=jnp.float32)
               + mb2_ref[...])                                              # (E, M)

        # ---- fn.max('m', 'r'): vectorized masked segment max over edges ----
        # One-hot destination mask (E, Nd); column n marks edges ending at n.
        # Padded edges carry an out-of-range dst id so they never match.
        dst_oh = (jax.lax.broadcasted_iota(jnp.int32, (E, Nd), 1) == dst_idx)
        # Nd is tiny (<= 8 here): static unroll of pure vector ops — each step
        # is a lane-broadcast select + sublane max-reduce (VPU/XLU), no scalar
        # read-modify-write chain and no per-edge dependent loads/stores.
        r_rows = [
            jnp.max(jnp.where(dst_oh[:, n:n + 1], msg, _NEG),
                    axis=0, keepdims=True)                                  # (1, M)
            for n in range(Nd)
        ]
        r = jnp.concatenate(r_rows, axis=0)                                 # (Nd, M)
        # zero-in-degree destinations -> 0 (DGL builtin max reducer semantics)
        r = jnp.where(r > _NEG_THRESH, r, 0.0)

        # ---- fc_udt: Linear on concat([x_dst, r]) -> ReLU -> Linear (split) ----
        g = (jnp.dot(xd_ref[...], uw1d_ref[...], preferred_element_type=jnp.float32)
             + jnp.dot(r, uw1m_ref[...], preferred_element_type=jnp.float32)
             + ub1_ref[...])                                                # (Nd, H)
        g = jnp.maximum(g, 0.0)
        dstdata = (jnp.dot(g, uw2_ref[...], preferred_element_type=jnp.float32)
                   + ub2_ref[...])                                          # (Nd, FO)

        # ---- torch.max(torch.stack(alist), 0): running max across relations ----
        out_ref[...] = jnp.maximum(out_ref[...], dstdata)


def _hetero_fused_call(ne_tbl, ef_all, si_all, di_all, x_src_all, x_dst_all, w):
    D, S, E, EF = ef_all.shape
    N, FIN = x_src_all.shape[1:]
    H = w['mw1e'].shape[3]
    M = w['mw2'].shape[3]
    FO = w['uw2'].shape[3]

    def rel4(d, s, ne):      # per-relation (d, s) blocks
        return (d, s, 0, 0)

    def by_src(d, s, ne):
        return (s, 0, 0)

    def by_dst(d, s, ne):
        return (d, 0, 0)

    grid_spec = pltpu.PrefetchScalarGridSpec(
        num_scalar_prefetch=1,                      # per-relation edge counts in SMEM
        grid=(D, S),
        in_specs=[
            pl.BlockSpec((None, None, E, EF), rel4),     # edge features
            pl.BlockSpec((None, None, E, 1), rel4),      # src indices
            pl.BlockSpec((None, None, E, 1), rel4),      # dst indices
            pl.BlockSpec((None, N, FIN), by_src),        # src node feats
            pl.BlockSpec((None, N, FIN), by_dst),        # dst node feats
            pl.BlockSpec((None, None, EF, H), rel4),     # fc_msg W1 (edge part)
            pl.BlockSpec((None, None, FIN, H), rel4),    # fc_msg W1 (src part)
            pl.BlockSpec((None, None, 1, H), rel4),      # fc_msg b1
            pl.BlockSpec((None, None, H, M), rel4),      # fc_msg W2
            pl.BlockSpec((None, None, 1, M), rel4),      # fc_msg b2
            pl.BlockSpec((None, None, FIN, H), rel4),    # fc_udt W1 (dst part)
            pl.BlockSpec((None, None, M, H), rel4),      # fc_udt W1 (msg part)
            pl.BlockSpec((None, None, 1, H), rel4),      # fc_udt b1
            pl.BlockSpec((None, None, H, FO), rel4),     # fc_udt W2 (lane-padded)
            pl.BlockSpec((None, None, 1, FO), rel4),     # fc_udt b2 (lane-padded)
        ],
        out_specs=pl.BlockSpec((None, N, FO), by_dst),   # lane-dense (N, 128) slab
    )
    return pl.pallas_call(
        _hetero_graphconv_kernel,
        out_shape=jax.ShapeDtypeStruct((D, N, FO), jnp.float32),
        grid_spec=grid_spec,
        compiler_params=pltpu.CompilerParams(
            dimension_semantics=("parallel", "arbitrary")),
    )(ne_tbl, ef_all, si_all, di_all, x_src_all, x_dst_all,
      w['mw1e'], w['mw1s'], w['mb1'], w['mw2'], w['mb2'],
      w['uw1d'], w['uw1m'], w['ub1'], w['uw2'], w['ub2'])


# ---------------------------- parameter setup ----------------------------

def _init_linear(key, d_in, d_out):
    kw, kb = jax.random.split(key)
    bound = 1.0 / (d_in ** 0.5)
    # stored as [in, out]; PyTorch nn.Linear uses y = x @ W.T + b with W [out, in]
    w = jax.random.uniform(kw, (d_in, d_out), jnp.float32, -bound, bound)
    b = jax.random.uniform(kb, (1, d_out), jnp.float32, -bound, bound)
    return w, b


def init_graph_conv(key, num_src, num_dst, num_edge, msg_size, num_out):
    k1, k2, k3, k4 = jax.random.split(key, 4)
    msg_w1, msg_b1 = _init_linear(k1, num_edge + num_src, HIDDEN)   # acts on [edge|src]
    msg_w2, msg_b2 = _init_linear(k2, HIDDEN, msg_size)
    udt_w1, udt_b1 = _init_linear(k3, num_dst + msg_size, HIDDEN)   # acts on [dst|r]
    udt_w2, udt_b2 = _init_linear(k4, HIDDEN, num_out)
    return dict(msg_w1=msg_w1, msg_b1=msg_b1, msg_w2=msg_w2, msg_b2=msg_b2,
                udt_w1=udt_w1, udt_b1=udt_b1, udt_w2=udt_w2, udt_b2=udt_b2)


def init_hetero_graph_conv(key, num_tx_ants, num_in_feats, msg_size, num_out_feats):
    params = {}
    for stype in num_tx_ants:
        for dtype in num_tx_ants:
            key, sub = jax.random.split(key)
            params[stype + '-to-' + dtype] = init_graph_conv(
                sub,
                num_in_feats[stype], num_in_feats[dtype],
                2 * (num_tx_ants[stype] + num_tx_ants[dtype]),
                msg_size, num_out_feats[dtype])
    return params


def pack_hetero_params(params, ntypes, num_tx_ants, num_in_feats, msg_size,
                       num_out_feats):
    """Pad & stack per-relation weights into (D, S, ...) slabs for the fused kernel."""
    D = S = len(ntypes)
    FIN = max(num_in_feats[t] for t in ntypes)
    EF = max(2 * (num_tx_ants[st] + num_tx_ants[dt]) for st in ntypes for dt in ntypes)
    H, M = HIDDEN, msg_size

    mw1e = np.zeros((D, S, EF, H), np.float32)
    mw1s = np.zeros((D, S, FIN, H), np.float32)
    mb1 = np.zeros((D, S, 1, H), np.float32)
    mw2 = np.zeros((D, S, H, M), np.float32)
    mb2 = np.zeros((D, S, 1, M), np.float32)
    uw1d = np.zeros((D, S, FIN, H), np.float32)
    uw1m = np.zeros((D, S, M, H), np.float32)
    ub1 = np.zeros((D, S, 1, H), np.float32)
    uw2 = np.zeros((D, S, H, FOUT_PAD), np.float32)
    ub2 = np.zeros((D, S, 1, FOUT_PAD), np.float32)

    for di, dt in enumerate(ntypes):
        for si, st in enumerate(ntypes):
            p = params[st + '-to-' + dt]
            ef = 2 * (num_tx_ants[st] + num_tx_ants[dt])
            fs, fd, fo = num_in_feats[st], num_in_feats[dt], num_out_feats[dt]
            w1 = np.asarray(p['msg_w1'])            # (ef + fs, H): [edge | src] rows
            mw1e[di, si, :ef, :] = w1[:ef]
            mw1s[di, si, :fs, :] = w1[ef:]
            mb1[di, si, 0, :] = np.asarray(p['msg_b1'])[0]
            mw2[di, si] = np.asarray(p['msg_w2'])
            mb2[di, si, 0, :] = np.asarray(p['msg_b2'])[0]
            u1 = np.asarray(p['udt_w1'])            # (fd + M, H): [dst | msg] rows
            uw1d[di, si, :fd, :] = u1[:fd]
            uw1m[di, si] = u1[fd:]
            ub1[di, si, 0, :] = np.asarray(p['udt_b1'])[0]
            uw2[di, si, :, :fo] = np.asarray(p['udt_w2'])
            ub2[di, si, 0, :fo] = np.asarray(p['udt_b2'])[0]

    return {k: jnp.asarray(v) for k, v in dict(
        mw1e=mw1e, mw1s=mw1s, mb1=mb1, mw2=mw2, mb2=mb2,
        uw1d=uw1d, uw1m=uw1m, ub1=ub1, uw2=uw2, ub2=ub2).items()}


# ------------------------------ forward pass ------------------------------

def hetero_graph_conv_forward(packed, ntypes, num_out_feats, graph, inputs):
    num_nodes = graph['num_nodes']
    D = S = len(ntypes)
    N_MAX = max(num_nodes[t] for t in ntypes)
    FIN = packed['mw1s'].shape[2]
    EF = packed['mw1e'].shape[2]
    e_counts = [int(v[0].shape[0]) for v in graph['edges'].values()]
    E_MAX = max(e_counts) if e_counts else 1
    E_MAX = max(E_MAX, 1)

    # NaN diagnostic on weights (mirrors the reference forward's check/print).
    if any(bool(jnp.isnan(packed[k]).any())
           for k in ('mw1e', 'mw1s', 'mw2', 'uw1d', 'uw1m', 'uw2')):
        print('nan is found in model parameters.')

    # Host-side packing of the heterograph into padded, stacked operands.
    x_stack = np.zeros((D, N_MAX, FIN), np.float32)
    for ti, t in enumerate(ntypes):
        if t in inputs:
            x = np.asarray(inputs[t], np.float32)
            x_stack[ti, :x.shape[0], :x.shape[1]] = x

    ef_all = np.zeros((D, S, E_MAX, EF), np.float32)
    si_all = np.zeros((D, S, E_MAX, 1), np.int32)
    di_all = np.full((D, S, E_MAX, 1), N_MAX, np.int32)   # OOB id => masked out
    ne_tbl = np.zeros((D, S), np.int32)
    for (st, dt), (src_idx, dst_idx, edge_feat) in graph['edges'].items():
        ne = int(src_idx.shape[0])
        if ne == 0 or st not in inputs:
            continue                                       # same skips as reference
        si_t, di_t = ntypes.index(st), ntypes.index(dt)
        ne_tbl[di_t, si_t] = ne
        ef_np = np.asarray(edge_feat, np.float32)
        ef_all[di_t, si_t, :ne, :ef_np.shape[1]] = ef_np
        si_all[di_t, si_t, :ne, 0] = np.asarray(src_idx, np.int32)
        di_all[di_t, si_t, :ne, 0] = np.asarray(dst_idx, np.int32)

    out = _hetero_fused_call(
        jnp.asarray(ne_tbl), jnp.asarray(ef_all), jnp.asarray(si_all),
        jnp.asarray(di_all), jnp.asarray(x_stack), jnp.asarray(x_stack), packed)

    rsts = {}
    for di_t, dt in enumerate(ntypes):
        if int(ne_tbl[di_t].sum()) > 0:                    # at least one relation applied
            rsts[dt] = out[di_t, :num_nodes[dt], :num_out_feats[dt]]
    return rsts


# ------------------------- pure-JAX reference (test) -------------------------

def _reference_forward(params, graph, inputs):
    num_nodes = graph['num_nodes']
    outputs = {}
    for (st, dt), (src_idx, dst_idx, edge_feat) in graph['edges'].items():
        if src_idx.shape[0] == 0 or st not in inputs:
            continue
        p = params[st + '-to-' + dt]
        msg_in = jnp.concatenate([edge_feat, inputs[st][src_idx]], axis=1)
        h = jnp.maximum(msg_in @ p['msg_w1'] + p['msg_b1'], 0.0)
        m = h @ p['msg_w2'] + p['msg_b2']
        nd = num_nodes[dt]
        r = jnp.full((nd, m.shape[1]), -jnp.inf, jnp.float32).at[dst_idx].max(m)
        deg = jnp.zeros((nd,), jnp.float32).at[dst_idx].add(1.0)
        r = jnp.where(deg[:, None] > 0, r, 0.0)
        g = jnp.maximum(jnp.concatenate([inputs[dt], r], axis=1) @ p['udt_w1']
                        + p['udt_b1'], 0.0)
        outputs.setdefault(dt, []).append(g @ p['udt_w2'] + p['udt_b2'])
    return {t: jnp.max(jnp.stack(a), axis=0) for t, a in outputs.items()}


# ---------------------------------- main ----------------------------------

if __name__ == "__main__":
    num_tx_ants = {'ue': 1, 'bs': 2}
    num_in_feats = {'ue': 6, 'bs': 10}
    msg_size = 16
    num_out_feats = {'ue': 8, 'bs': 8}
    num_nodes = {'ue': 8, 'bs': 4}
    num_edges = 12
    ntypes = list(num_tx_ants.keys())

    root = jax.random.PRNGKey(0)
    k_param, k_graph, k_inputs = jax.random.split(root, 3)

    params = init_hetero_graph_conv(k_param, num_tx_ants, num_in_feats,
                                    msg_size, num_out_feats)
    packed = pack_hetero_params(params, ntypes, num_tx_ants, num_in_feats,
                                msg_size, num_out_feats)

    # Synthetic heterograph: one relation per (stype, dtype) pair.
    edges = {}
    for stype in ntypes:
        for dtype in ntypes:
            k_graph, ks, kd, kf = jax.random.split(k_graph, 4)
            src_idx = jax.random.randint(ks, (num_edges,), 0, num_nodes[stype],
                                         dtype=jnp.int32)
            dst_idx = jax.random.randint(kd, (num_edges,), 0, num_nodes[dtype],
                                         dtype=jnp.int32)
            efeat_dim = 2 * (num_tx_ants[stype] + num_tx_ants[dtype])
            edge_feat = jax.random.normal(kf, (num_edges, efeat_dim), jnp.float32)
            edges[(stype, dtype)] = (src_idx, dst_idx, edge_feat)
    graph = {'num_nodes': num_nodes, 'edges': edges}

    inputs = {}
    for ntype in ntypes:
        k_inputs, kx = jax.random.split(k_inputs)
        inputs[ntype] = jax.random.normal(
            kx, (num_nodes[ntype], num_in_feats[ntype]), jnp.float32)

    rsts = hetero_graph_conv_forward(packed, ntypes, num_out_feats, graph, inputs)
    jax.block_until_ready(rsts)

    ref = _reference_forward(params, graph, inputs)
    for ntype in sorted(rsts):
        assert rsts[ntype].shape == (num_nodes[ntype], num_out_feats[ntype]), \
            rsts[ntype].shape
        assert bool(jnp.isfinite(rsts[ntype]).all())
        err = float(jnp.max(jnp.abs(rsts[ntype] - ref[ntype])))
        assert err < 5e-2, (ntype, err)
    print("KERNEL_OK")
</pallas_src>

<mosaic_0001>
module attributes {stable_mosaic.version = 11 : i64} {
  func.func @_hetero_graphconv_kernel(%arg0: i32, %arg1: i32, %arg2: memref<2x2xi32, #tpu.memory_space<smem>>, %arg3: memref<1x1x12x8xf32, #tpu.memory_space<vmem>>, %arg4: memref<1x1x12x1xi32, #tpu.memory_space<vmem>>, %arg5: memref<1x1x12x1xi32, #tpu.memory_space<vmem>>, %arg6: memref<1x8x10xf32, #tpu.memory_space<vmem>>, %arg7: memref<1x8x10xf32, #tpu.memory_space<vmem>>, %arg8: memref<1x1x8x16xf32, #tpu.memory_space<vmem>>, %arg9: memref<1x1x10x16xf32, #tpu.memory_space<vmem>>, %arg10: memref<1x1x1x16xf32, #tpu.memory_space<vmem>>, %arg11: memref<1x1x16x16xf32, #tpu.memory_space<vmem>>, %arg12: memref<1x1x1x16xf32, #tpu.memory_space<vmem>>, %arg13: memref<1x1x10x16xf32, #tpu.memory_space<vmem>>, %arg14: memref<1x1x16x16xf32, #tpu.memory_space<vmem>>, %arg15: memref<1x1x1x16xf32, #tpu.memory_space<vmem>>, %arg16: memref<1x1x16x128xf32, #tpu.memory_space<vmem>>, %arg17: memref<1x1x1x128xf32, #tpu.memory_space<vmem>>, %arg18: memref<1x8x128xf32, #tpu.memory_space<vmem>>) attributes {dimension_semantics = [#tpu.dimension_semantics<parallel>, #tpu.dimension_semantics<arbitrary>], iteration_bounds = array<i64: 2, 2>, scalar_prefetch = 1 : i64, scratch_operands = 0 : i64, tpu.core_type = #tpu.core_type<tc>, window_params = [{transform_indices = @transform_0, window_bounds = array<i64: 1, 1, 12, 8>}, {transform_indices = @transform_1, window_bounds = array<i64: 1, 1, 12, 1>}, {transform_indices = @transform_2, window_bounds = array<i64: 1, 1, 12, 1>}, {transform_indices = @transform_3, window_bounds = array<i64: 1, 8, 10>}, {transform_indices = @transform_4, window_bounds = array<i64: 1, 8, 10>}, {transform_indices = @transform_5, window_bounds = array<i64: 1, 1, 8, 16>}, {transform_indices = @transform_6, window_bounds = array<i64: 1, 1, 10, 16>}, {transform_indices = @transform_7, window_bounds = array<i64: 1, 1, 1, 16>}, {transform_indices = @transform_8, window_bounds = array<i64: 1, 1, 16, 16>}, {transform_indices = @transform_9, window_bounds = array<i64: 1, 1, 1, 16>}, {transform_indices = @transform_10, window_bounds = array<i64: 1, 1, 10, 16>}, {transform_indices = @transform_11, window_bounds = array<i64: 1, 1, 16, 16>}, {transform_indices = @transform_12, window_bounds = array<i64: 1, 1, 1, 16>}, {transform_indices = @transform_13, window_bounds = array<i64: 1, 1, 16, 128>}, {transform_indices = @transform_14, window_bounds = array<i64: 1, 1, 1, 128>}, {transform_indices = @transform_15, window_bounds = array<i64: 1, 8, 128>}]} {
    %c0_i32 = arith.constant 0 : i32
    %0 = arith.cmpi eq, %arg1, %c0_i32 : i32
    %1 = arith.extui %0 : i1 to i32
    %c0_i32_0 = arith.constant 0 : i32
    %2 = arith.cmpi ne, %1, %c0_i32_0 : i32
    scf.if %2 {
      %cst = arith.constant -3.000000e+38 : f32
      %9 = vector.broadcast %cst : f32 to vector<8x128xf32>
      %c0 = arith.constant 0 : index
      %c0_3 = arith.constant 0 : index
      %c0_4 = arith.constant 0 : index
      %10 = vector.load %arg18[%c0, %c0_3, %c0_4] : memref<1x8x128xf32, #tpu.memory_space<vmem>>, vector<1x8x128xf32>
      %11 = vector.shape_cast %10 : vector<1x8x128xf32> to vector<8x128xf32>
      %12 = vector.shape_cast %9 : vector<8x128xf32> to vector<1x8x128xf32>
      tpu.vector_store %arg18[%c0, %c0_3, %c0_4], %12 {strides = array<i32>} : memref<1x8x128xf32, #tpu.memory_space<vmem>>, vector<1x8x128xf32>,
    } else {
    }
    %3 = arith.index_cast %arg0 : i32 to index
    %4 = arith.index_cast %arg1 : i32 to index
    %5 = memref.load %arg2[%3, %4] : memref<2x2xi32, #tpu.memory_space<smem>>
    %c0_i32_1 = arith.constant 0 : i32
    %6 = arith.cmpi sgt, %5, %c0_i32_1 : i32
    %7 = arith.extui %6 : i1 to i32
    %c0_i32_2 = arith.constant 0 : i32
    %8 = arith.cmpi ne, %7, %c0_i32_2 : i32
    scf.if %8 {
      %c0 = arith.constant 0 : index
      %c0_3 = arith.constant 0 : index
      %c0_4 = arith.constant 0 : index
      %c0_5 = arith.constant 0 : index
      %9 = vector.load %arg3[%c0, %c0_3, %c0_4, %c0_5] : memref<1x1x12x8xf32, #tpu.memory_space<vmem>>, vector<1x1x12x8xf32>
      %10 = vector.shape_cast %9 : vector<1x1x12x8xf32> to vector<12x8xf32>
      %c0_6 = arith.constant 0 : index
      %c0_7 = arith.constant 0 : index
      %c0_8 = arith.constant 0 : index
      %c0_9 = arith.constant 0 : index
      %11 = vector.load %arg4[%c0_6, %c0_7, %c0_8, %c0_9] : memref<1x1x12x1xi32, #tpu.memory_space<vmem>>, vector<1x1x12x1xi32>
      %12 = vector.shape_cast %11 : vector<1x1x12x1xi32> to vector<12x1xi32>
      %c0_10 = arith.constant 0 : index
      %c0_11 = arith.constant 0 : index
      %c0_12 = arith.constant 0 : index
      %c0_13 = arith.constant 0 : index
      %13 = vector.load %arg5[%c0_10, %c0_11, %c0_12, %c0_13] : memref<1x1x12x1xi32, #tpu.memory_space<vmem>>, vector<1x1x12x1xi32>
      %14 = vector.shape_cast %13 : vector<1x1x12x1xi32> to vector<12x1xi32>
      %15 = tpu.iota {dimensions = array<i32: 1>} : vector<12x8xi32>
      %16 = vector.broadcast %12 : vector<12x1xi32> to vector<12x8xi32>
      %17 = arith.cmpi eq, %15, %16 : vector<12x8xi32>
      %18 = arith.extui %17 : vector<12x8xi1> to vector<12x8xi32>
      %19 = arith.sitofp %18 : vector<12x8xi32> to vector<12x8xf32>
      %c0_14 = arith.constant 0 : index
      %c0_15 = arith.constant 0 : index
      %c0_16 = arith.constant 0 : index
      %20 = vector.load %arg6[%c0_14, %c0_15, %c0_16] : memref<1x8x10xf32, #tpu.memory_space<vmem>>, vector<1x8x10xf32>
      %21 = vector.shape_cast %20 : vector<1x8x10xf32> to vector<8x10xf32>
      %c0_17 = arith.constant 0 : index
      %c0_18 = arith.constant 0 : index
      %c0_19 = arith.constant 0 : index
      %c0_20 = arith.constant 0 : index
      %22 = vector.load %arg9[%c0_17, %c0_18, %c0_19, %c0_20] : memref<1x1x10x16xf32, #tpu.memory_space<vmem>>, vector<1x1x10x16xf32>
      %23 = vector.shape_cast %22 : vector<1x1x10x16xf32> to vector<10x16xf32>
      %cst = arith.constant dense<0.000000e+00> : vector<8x16xf32>
      %24 = tpu.matmul %21, %23, %cst {dimension_numbers = #tpu.dot_dimension_numbers<[1], [0], [0], [1], [0, 0, 1, 1], [], []>} : vector<8x10xf32>, vector<10x16xf32>, vector<8x16xf32> -> vector<8x16xf32>
      %c0_21 = arith.constant 0 : index
      %c0_22 = arith.constant 0 : index
      %c0_23 = arith.constant 0 : index
      %c0_24 = arith.constant 0 : index
      %25 = vector.load %arg8[%c0_21, %c0_22, %c0_23, %c0_24] : memref<1x1x8x16xf32, #tpu.memory_space<vmem>>, vector<1x1x8x16xf32>
      %26 = vector.shape_cast %25 : vector<1x1x8x16xf32> to vector<8x16xf32>
      %cst_25 = arith.constant dense<0.000000e+00> : vector<12x16xf32>
      %27 = tpu.matmul %10, %26, %cst_25 {dimension_numbers = #tpu.dot_dimension_numbers<[1], [0], [0], [1], [0, 0, 1, 1], [], []>} : vector<12x8xf32>, vector<8x16xf32>, vector<12x16xf32> -> vector<12x16xf32>
      %cst_26 = arith.constant dense<0.000000e+00> : vector<12x16xf32>
      %28 = tpu.matmul %19, %24, %cst_26 {dimension_numbers = #tpu.dot_dimension_numbers<[1], [0], [0], [1], [0, 0, 1, 1], [], []>} : vector<12x8xf32>, vector<8x16xf32>, vector<12x16xf32> -> vector<12x16xf32>
      %29 = arith.addf %27, %28 : vector<12x16xf32>
      %c0_27 = arith.constant 0 : index
      %c0_28 = arith.constant 0 : index
      %c0_29 = arith.constant 0 : index
      %c0_30 = arith.constant 0 : index
      %30 = vector.load %arg10[%c0_27, %c0_28, %c0_29, %c0_30] : memref<1x1x1x16xf32, #tpu.memory_space<vmem>>, vector<1x1x1x16xf32>
      %31 = vector.shape_cast %30 : vector<1x1x1x16xf32> to vector<1x16xf32>
      %32 = vector.broadcast %31 : vector<1x16xf32> to vector<12x16xf32>
      %33 = arith.addf %29, %32 : vector<12x16xf32>
      %cst_31 = arith.constant 0.000000e+00 : f32
      %34 = vector.broadcast %cst_31 : f32 to vector<12x16xf32>
      %35 = arith.maximumf %33, %34 : vector<12x16xf32>
      %c0_32 = arith.constant 0 : index
      %c0_33 = arith.constant 0 : index
      %c0_34 = arith.constant 0 : index
      %c0_35 = arith.constant 0 : index
      %36 = vector.load %arg11[%c0_32, %c0_33, %c0_34, %c0_35] : memref<1x1x16x16xf32, #tpu.memory_space<vmem>>, vector<1x1x16x16xf32>
      %37 = vector.shape_cast %36 : vector<1x1x16x16xf32> to vector<16x16xf32>
      %cst_36 = arith.constant dense<0.000000e+00> : vector<12x16xf32>
      %38 = tpu.matmul %35, %37, %cst_36 {dimension_numbers = #tpu.dot_dimension_numbers<[1], [0], [0], [1], [0, 0, 1, 1], [], []>} : vector<12x16xf32>, vector<16x16xf32>, vector<12x16xf32> -> vector<12x16xf32>
      %c0_37 = arith.constant 0 : index
      %c0_38 = arith.constant 0 : index
      %c0_39 = arith.constant 0 : index
      %c0_40 = arith.constant 0 : index
      %39 = vector.load %arg12[%c0_37, %c0_38, %c0_39, %c0_40] : memref<1x1x1x16xf32, #tpu.memory_space<vmem>>, vector<1x1x1x16xf32>
      %40 = vector.shape_cast %39 : vector<1x1x1x16xf32> to vector<1x16xf32>
      %41 = vector.broadcast %40 : vector<1x16xf32> to vector<12x16xf32>
      %42 = arith.addf %38, %41 : vector<12x16xf32>
      %43 = tpu.iota {dimensions = array<i32: 1>} : vector<12x8xi32>
      %44 = vector.broadcast %14 : vector<12x1xi32> to vector<12x8xi32>
      %45 = arith.cmpi eq, %43, %44 : vector<12x8xi32>
      %46 = vector.extract_strided_slice %45 {offsets = [0, 0], sizes = [12, 1], strides = [1, 1]} : vector<12x8xi1> to vector<12x1xi1>
      %cst_41 = arith.constant -3.000000e+38 : f32
      %47 = vector.shape_cast %46 : vector<12x1xi1> to vector<12x1xi1>
      %48 = vector.broadcast %47 : vector<12x1xi1> to vector<12x16xi1>
      %49 = vector.broadcast %cst_41 : f32 to vector<12x16xf32>
      %50 = arith.select %48, %42, %49 : vector<12x16xi1>, vector<12x16xf32>
      %cst_42 = arith.constant dense<0xFF800000> : vector<16xf32>
      %51 = vector.multi_reduction <maximumf>, %50, %cst_42 [0] : vector<12x16xf32> to vector<16xf32>
      %52 = vector.shape_cast %51 : vector<16xf32> to vector<1x16xf32>
      %53 = vector.extract_strided_slice %45 {offsets = [0, 1], sizes = [12, 1], strides = [1, 1]} : vector<12x8xi1> to vector<12x1xi1>
      %cst_43 = arith.constant -3.000000e+38 : f32
      %54 = vector.shape_cast %53 : vector<12x1xi1> to vector<12x1xi1>
      %55 = vector.broadcast %54 : vector<12x1xi1> to vector<12x16xi1>
      %56 = vector.broadcast %cst_43 : f32 to vector<12x16xf32>
      %57 = arith.select %55, %42, %56 : vector<12x16xi1>, vector<12x16xf32>
      %cst_44 = arith.constant dense<0xFF800000> : vector<16xf32>
      %58 = vector.multi_reduction <maximumf>, %57, %cst_44 [0] : vector<12x16xf32> to vector<16xf32>
      %59 = vector.shape_cast %58 : vector<16xf32> to vector<1x16xf32>
      %60 = vector.extract_strided_slice %45 {offsets = [0, 2], sizes = [12, 1], strides = [1, 1]} : vector<12x8xi1> to vector<12x1xi1>
      %cst_45 = arith.constant -3.000000e+38 : f32
      %61 = vector.shape_cast %60 : vector<12x1xi1> to vector<12x1xi1>
      %62 = vector.broadcast %61 : vector<12x1xi1> to vector<12x16xi1>
      %63 = vector.broadcast %cst_45 : f32 to vector<12x16xf32>
      %64 = arith.select %62, %42, %63 : vector<12x16xi1>, vector<12x16xf32>
      %cst_46 = arith.constant dense<0xFF800000> : vector<16xf32>
      %65 = vector.multi_reduction <maximumf>, %64, %cst_46 [0] : vector<12x16xf32> to vector<16xf32>
      %66 = vector.shape_cast %65 : vector<16xf32> to vector<1x16xf32>
      %67 = vector.extract_strided_slice %45 {offsets = [0, 3], sizes = [12, 1], strides = [1, 1]} : vector<12x8xi1> to vector<12x1xi1>
      %cst_47 = arith.constant -3.000000e+38 : f32
      %68 = vector.shape_cast %67 : vector<12x1xi1> to vector<12x1xi1>
      %69 = vector.broadcast %68 : vector<12x1xi1> to vector<12x16xi1>
      %70 = vector.broadcast %cst_47 : f32 to vector<12x16xf32>
      %71 = arith.select %69, %42, %70 : vector<12x16xi1>, vector<12x16xf32>
      %cst_48 = arith.constant dense<0xFF800000> : vector<16xf32>
      %72 = vector.multi_reduction <maximumf>, %71, %cst_48 [0] : vector<12x16xf32> to vector<16xf32>
      %73 = vector.shape_cast %72 : vector<16xf32> to vector<1x16xf32>
      %74 = vector.extract_strided_slice %45 {offsets = [0, 4], sizes = [12, 1], strides = [1, 1]} : vector<12x8xi1> to vector<12x1xi1>
      %cst_49 = arith.constant -3.000000e+38 : f32
      %75 = vector.shape_cast %74 : vector<12x1xi1> to vector<12x1xi1>
      %76 = vector.broadcast %75 : vector<12x1xi1> to vector<12x16xi1>
      %77 = vector.broadcast %cst_49 : f32 to vector<12x16xf32>
      %78 = arith.select %76, %42, %77 : vector<12x16xi1>, vector<12x16xf32>
      %cst_50 = arith.constant dense<0xFF800000> : vector<16xf32>
      %79 = vector.multi_reduction <maximumf>, %78, %cst_50 [0] : vector<12x16xf32> to vector<16xf32>
      %80 = vector.shape_cast %79 : vector<16xf32> to vector<1x16xf32>
      %81 = vector.extract_strided_slice %45 {offsets = [0, 5], sizes = [12, 1], strides = [1, 1]} : vector<12x8xi1> to vector<12x1xi1>
      %cst_51 = arith.constant -3.000000e+38 : f32
      %82 = vector.shape_cast %81 : vector<12x1xi1> to vector<12x1xi1>
      %83 = vector.broadcast %82 : vector<12x1xi1> to vector<12x16xi1>
      %84 = vector.broadcast %cst_51 : f32 to vector<12x16xf32>
      %85 = arith.select %83, %42, %84 : vector<12x16xi1>, vector<12x16xf32>
      %cst_52 = arith.constant dense<0xFF800000> : vector<16xf32>
      %86 = vector.multi_reduction <maximumf>, %85, %cst_52 [0] : vector<12x16xf32> to vector<16xf32>
      %87 = vector.shape_cast %86 : vector<16xf32> to vector<1x16xf32>
      %88 = vector.extract_strided_slice %45 {offsets = [0, 6], sizes = [12, 1], strides = [1, 1]} : vector<12x8xi1> to vector<12x1xi1>
      %cst_53 = arith.constant -3.000000e+38 : f32
      %89 = vector.shape_cast %88 : vector<12x1xi1> to vector<12x1xi1>
      %90 = vector.broadcast %89 : vector<12x1xi1> to vector<12x16xi1>
      %91 = vector.broadcast %cst_53 : f32 to vector<12x16xf32>
      %92 = arith.select %90, %42, %91 : vector<12x16xi1>, vector<12x16xf32>
      %cst_54 = arith.constant dense<0xFF800000> : vector<16xf32>
      %93 = vector.multi_reduction <maximumf>, %92, %cst_54 [0] : vector<12x16xf32> to vector<16xf32>
      %94 = vector.shape_cast %93 : vector<16xf32> to vector<1x16xf32>
      %95 = vector.extract_strided_slice %45 {offsets = [0, 7], sizes = [12, 1], strides = [1, 1]} : vector<12x8xi1> to vector<12x1xi1>
      %cst_55 = arith.constant -3.000000e+38 : f32
      %96 = vector.shape_cast %95 : vector<12x1xi1> to vector<12x1xi1>
      %97 = vector.broadcast %96 : vector<12x1xi1> to vector<12x16xi1>
      %98 = vector.broadcast %cst_55 : f32 to vector<12x16xf32>
      %99 = arith.select %97, %42, %98 : vector<12x16xi1>, vector<12x16xf32>
      %cst_56 = arith.constant dense<0xFF800000> : vector<16xf32>
      %100 = vector.multi_reduction <maximumf>, %99, %cst_56 [0] : vector<12x16xf32> to vector<16xf32>
      %101 = vector.shape_cast %100 : vector<16xf32> to vector<1x16xf32>
      %102 = tpu.concatenate %52, %59, %66, %73, %80, %87, %94, %101 in 0 : vector<1x16xf32>, vector<1x16xf32>, vector<1x16xf32>, vector<1x16xf32>, vector<1x16xf32>, vector<1x16xf32>, vector<1x16xf32>, vector<1x16xf32> -> vector<8x16xf32>
      %cst_57 = arith.constant -9.99999968E+37 : f32
      %103 = vector.broadcast %cst_57 : f32 to vector<8x16xf32>
      %104 = arith.cmpf ogt, %102, %103 : vector<8x16xf32>
      %cst_58 = arith.constant 0.000000e+00 : f32
      %105 = vector.broadcast %cst_58 : f32 to vector<8x16xf32>
      %106 = arith.select %104, %102, %105 : vector<8x16xi1>, vector<8x16xf32>
      %c0_59 = arith.constant 0 : index
      %c0_60 = arith.constant 0 : index
      %c0_61 = arith.constant 0 : index
      %107 = vector.load %arg7[%c0_59, %c0_60, %c0_61] : memref<1x8x10xf32, #tpu.memory_space<vmem>>, vector<1x8x10xf32>
      %108 = vector.shape_cast %107 : vector<1x8x10xf32> to vector<8x10xf32>
      %c0_62 = arith.constant 0 : index
      %c0_63 = arith.constant 0 : index
      %c0_64 = arith.constant 0 : index
      %c0_65 = arith.constant 0 : index
      %109 = vector.load %arg13[%c0_62, %c0_63, %c0_64, %c0_65] : memref<1x1x10x16xf32, #tpu.memory_space<vmem>>, vector<1x1x10x16xf32>
      %110 = vector.shape_cast %109 : vector<1x1x10x16xf32> to vector<10x16xf32>
      %cst_66 = arith.constant dense<0.000000e+00> : vector<8x16xf32>
      %111 = tpu.matmul %108, %110, %cst_66 {dimension_numbers = #tpu.dot_dimension_numbers<[1], [0], [0], [1], [0, 0, 1, 1], [], []>} : vector<8x10xf32>, vector<10x16xf32>, vector<8x16xf32> -> vector<8x16xf32>
      %c0_67 = arith.constant 0 : index
      %c0_68 = arith.constant 0 : index
      %c0_69 = arith.constant 0 : index
      %c0_70 = arith.constant 0 : index
      %112 = vector.load %arg14[%c0_67, %c0_68, %c0_69, %c0_70] : memref<1x1x16x16xf32, #tpu.memory_space<vmem>>, vector<1x1x16x16xf32>
      %113 = vector.shape_cast %112 : vector<1x1x16x16xf32> to vector<16x16xf32>
      %cst_71 = arith.constant dense<0.000000e+00> : vector<8x16xf32>
      %114 = tpu.matmul %106, %113, %cst_71 {dimension_numbers = #tpu.dot_dimension_numbers<[1], [0], [0], [1], [0, 0, 1, 1], [], []>} : vector<8x16xf32>, vector<16x16xf32>, vector<8x16xf32> -> vector<8x16xf32>
      %115 = arith.addf %111, %114 : vector<8x16xf32>
      %c0_72 = arith.constant 0 : index
      %c0_73 = arith.constant 0 : index
      %c0_74 = arith.constant 0 : index
      %c0_75 = arith.constant 0 : index
      %116 = vector.load %arg15[%c0_72, %c0_73, %c0_74, %c0_75] : memref<1x1x1x16xf32, #tpu.memory_space<vmem>>, vector<1x1x1x16xf32>
      %117 = vector.shape_cast %116 : vector<1x1x1x16xf32> to vector<1x16xf32>
      %118 = vector.broadcast %117 : vector<1x16xf32> to vector<8x16xf32>
      %119 = arith.addf %115, %118 : vector<8x16xf32>
      %cst_76 = arith.constant 0.000000e+00 : f32
      %120 = vector.broadcast %cst_76 : f32 to vector<8x16xf32>
      %121 = arith.maximumf %119, %120 : vector<8x16xf32>
      %c0_77 = arith.constant 0 : index
      %c0_78 = arith.constant 0 : index
      %c0_79 = arith.constant 0 : index
      %c0_80 = arith.constant 0 : index
      %122 = vector.load %arg16[%c0_77, %c0_78, %c0_79, %c0_80] : memref<1x1x16x128xf32, #tpu.memory_space<vmem>>, vector<1x1x16x128xf32>
      %123 = vector.shape_cast %122 : vector<1x1x16x128xf32> to vector<16x128xf32>
      %cst_81 = arith.constant dense<0.000000e+00> : vector<8x128xf32>
      %124 = tpu.matmul %121, %123, %cst_81 {dimension_numbers = #tpu.dot_dimension_numbers<[1], [0], [0], [1], [0, 0, 1, 1], [], []>} : vector<8x16xf32>, vector<16x128xf32>, vector<8x128xf32> -> vector<8x128xf32>
      %c0_82 = arith.constant 0 : index
      %c0_83 = arith.constant 0 : index
      %c0_84 = arith.constant 0 : index
      %c0_85 = arith.constant 0 : index
      %125 = vector.load %arg17[%c0_82, %c0_83, %c0_84, %c0_85] : memref<1x1x1x128xf32, #tpu.memory_space<vmem>>, vector<1x1x1x128xf32>
      %126 = vector.shape_cast %125 : vector<1x1x1x128xf32> to vector<1x128xf32>
      %127 = vector.broadcast %126 : vector<1x128xf32> to vector<8x128xf32>
      %128 = arith.addf %124, %127 : vector<8x128xf32>
      %c0_86 = arith.constant 0 : index
      %c0_87 = arith.constant 0 : index
      %c0_88 = arith.constant 0 : index
      %129 = vector.load %arg18[%c0_86, %c0_87, %c0_88] : memref<1x8x128xf32, #tpu.memory_space<vmem>>, vector<1x8x128xf32>
      %130 = vector.shape_cast %129 : vector<1x8x128xf32> to vector<8x128xf32>
      %131 = arith.maximumf %130, %128 : vector<8x128xf32>
      %c0_89 = arith.constant 0 : index
      %c0_90 = arith.constant 0 : index
      %c0_91 = arith.constant 0 : index
      %132 = vector.load %arg18[%c0_89, %c0_90, %c0_91] : memref<1x8x128xf32, #tpu.memory_space<vmem>>, vector<1x8x128xf32>
      %133 = vector.shape_cast %132 : vector<1x8x128xf32> to vector<8x128xf32>
      %134 = vector.shape_cast %131 : vector<8x128xf32> to vector<1x8x128xf32>
      tpu.vector_store %arg18[%c0_89, %c0_90, %c0_91], %134 {strides = array<i32>} : memref<1x8x128xf32, #tpu.memory_space<vmem>>, vector<1x8x128xf32>,
    } else {
    }
    return
  }
  func.func @transform_0(%arg0: i32, %arg1: i32, %arg2: memref<2x2xi32, #tpu.memory_space<smem>>) -> (i32, i32, i32, i32) {
    %c0_i32 = arith.constant 0 : i32
    %c0_i32_0 = arith.constant 0 : i32
    %c0_i32_1 = arith.constant 0 : i32
    return %arg0, %arg1, %c0_i32, %c0_i32_0 : i32, i32, i32, i32
  }
  func.func @transform_1(%arg0: i32, %arg1: i32, %arg2: memref<2x2xi32, #tpu.memory_space<smem>>) -> (i32, i32, i32, i32) {
    %c0_i32 = arith.constant 0 : i32
    %c0_i32_0 = arith.constant 0 : i32
    %c0_i32_1 = arith.constant 0 : i32
    return %arg0, %arg1, %c0_i32, %c0_i32_0 : i32, i32, i32, i32
  }
  func.func @transform_2(%arg0: i32, %arg1: i32, %arg2: memref<2x2xi32, #tpu.memory_space<smem>>) -> (i32, i32, i32, i32) {
    %c0_i32 = arith.constant 0 : i32
    %c0_i32_0 = arith.constant 0 : i32
    %c0_i32_1 = arith.constant 0 : i32
    return %arg0, %arg1, %c0_i32, %c0_i32_0 : i32, i32, i32, i32
  }
  func.func @transform_3(%arg0: i32, %arg1: i32, %arg2: memref<2x2xi32, #tpu.memory_space<smem>>) -> (i32, i32, i32) {
    %c0_i32 = arith.constant 0 : i32
    %c0_i32_0 = arith.constant 0 : i32
    %c0_i32_1 = arith.constant 0 : i32
    return %arg1, %c0_i32, %c0_i32_0 : i32, i32, i32
  }
  func.func @transform_4(%arg0: i32, %arg1: i32, %arg2: memref<2x2xi32, #tpu.memory_space<smem>>) -> (i32, i32, i32) {
    %c0_i32 = arith.constant 0 : i32
    %c0_i32_0 = arith.constant 0 : i32
    %c0_i32_1 = arith.constant 0 : i32
    return %arg0, %c0_i32, %c0_i32_0 : i32, i32, i32
  }
  func.func @transform_5(%arg0: i32, %arg1: i32, %arg2: memref<2x2xi32, #tpu.memory_space<smem>>) -> (i32, i32, i32, i32) {
    %c0_i32 = arith.constant 0 : i32
    %c0_i32_0 = arith.constant 0 : i32
    %c0_i32_1 = arith.constant 0 : i32
    return %arg0, %arg1, %c0_i32, %c0_i32_0 : i32, i32, i32, i32
  }
  func.func @transform_6(%arg0: i32, %arg1: i32, %arg2: memref<2x2xi32, #tpu.memory_space<smem>>) -> (i32, i32, i32, i32) {
    %c0_i32 = arith.constant 0 : i32
    %c0_i32_0 = arith.constant 0 : i32
    %c0_i32_1 = arith.constant 0 : i32
    return %arg0, %arg1, %c0_i32, %c0_i32_0 : i32, i32, i32, i32
  }
  func.func @transform_7(%arg0: i32, %arg1: i32, %arg2: memref<2x2xi32, #tpu.memory_space<smem>>) -> (i32, i32, i32, i32) {
    %c0_i32 = arith.constant 0 : i32
    %c0_i32_0 = arith.constant 0 : i32
    %c0_i32_1 = arith.constant 0 : i32
    return %arg0, %arg1, %c0_i32, %c0_i32_0 : i32, i32, i32, i32
  }
  func.func @transform_8(%arg0: i32, %arg1: i32, %arg2: memref<2x2xi32, #tpu.memory_space<smem>>) -> (i32, i32, i32, i32) {
    %c0_i32 = arith.constant 0 : i32
    %c0_i32_0 = arith.constant 0 : i32
    %c0_i32_1 = arith.constant 0 : i32
    return %arg0, %arg1, %c0_i32, %c0_i32_0 : i32, i32, i32, i32
  }
  func.func @transform_9(%arg0: i32, %arg1: i32, %arg2: memref<2x2xi32, #tpu.memory_space<smem>>) -> (i32, i32, i32, i32) {
    %c0_i32 = arith.constant 0 : i32
    %c0_i32_0 = arith.constant 0 : i32
    %c0_i32_1 = arith.constant 0 : i32
    return %arg0, %arg1, %c0_i32, %c0_i32_0 : i32, i32, i32, i32
  }
  func.func @transform_10(%arg0: i32, %arg1: i32, %arg2: memref<2x2xi32, #tpu.memory_space<smem>>) -> (i32, i32, i32, i32) {
    %c0_i32 = arith.constant 0 : i32
    %c0_i32_0 = arith.constant 0 : i32
    %c0_i32_1 = arith.constant 0 : i32
    return %arg0, %arg1, %c0_i32, %c0_i32_0 : i32, i32, i32, i32
  }
  func.func @transform_11(%arg0: i32, %arg1: i32, %arg2: memref<2x2xi32, #tpu.memory_space<smem>>) -> (i32, i32, i32, i32) {
    %c0_i32 = arith.constant 0 : i32
    %c0_i32_0 = arith.constant 0 : i32
    %c0_i32_1 = arith.constant 0 : i32
    return %arg0, %arg1, %c0_i32, %c0_i32_0 : i32, i32, i32, i32
  }
  func.func @transform_12(%arg0: i32, %arg1: i32, %arg2: memref<2x2xi32, #tpu.memory_space<smem>>) -> (i32, i32, i32, i32) {
    %c0_i32 = arith.constant 0 : i32
    %c0_i32_0 = arith.constant 0 : i32
    %c0_i32_1 = arith.constant 0 : i32
    return %arg0, %arg1, %c0_i32, %c0_i32_0 : i32, i32, i32, i32
  }
  func.func @transform_13(%arg0: i32, %arg1: i32, %arg2: memref<2x2xi32, #tpu.memory_space<smem>>) -> (i32, i32, i32, i32) {
    %c0_i32 = arith.constant 0 : i32
    %c0_i32_0 = arith.constant 0 : i32
    %c0_i32_1 = arith.constant 0 : i32
    return %arg0, %arg1, %c0_i32, %c0_i32_0 : i32, i32, i32, i32
  }
  func.func @transform_14(%arg0: i32, %arg1: i32, %arg2: memref<2x2xi32, #tpu.memory_space<smem>>) -> (i32, i32, i32, i32) {
    %c0_i32 = arith.constant 0 : i32
    %c0_i32_0 = arith.constant 0 : i32
    %c0_i32_1 = arith.constant 0 : i32
    return %arg0, %arg1, %c0_i32, %c0_i32_0 : i32, i32, i32, i32
  }
  func.func @transform_15(%arg0: i32, %arg1: i32, %arg2: memref<2x2xi32, #tpu.memory_space<smem>>) -> (i32, i32, i32) {
    %c0_i32 = arith.constant 0 : i32
    %c0_i32_0 = arith.constant 0 : i32
    %c0_i32_1 = arith.constant 0 : i32
    return %arg0, %c0_i32, %c0_i32_0 : i32, i32, i32
  }
}

</mosaic_0001>

<bundles_post_ra>
// kernel: tpu_custom_call.1
= control target key start
LH: loop header
LB: loop body
LE: loop exit
PB: predicated region body
PF: predicated region fallthrough
CT: control target
= control target key end

     0   :  { %s2002_s24 = smov [#allocation3]   ;;  %s2403_s0 = inlined_call_operand.vmem [shape: s32[2,2], index: 0, kind: input, shape index: {}]   ;;  %s2404_s1 = inlined_call_operand.vmem [shape: f32[2,2,12,8], index: 1, kind: input, shape index: {}]   ;;  %s2405_s2 = inlined_call_operand.vmem [shape: s32[2,2,12,1], index: 2, kind: input, shape index: {}]   ;;  %s2406_s3 = inlined_call_operand.vmem [shape: s32[2,2,12,1], index: 3, kind: input, shape index: {}]   ;;  %s2407_s4 = inlined_call_operand.vmem [shape: f32[2,8,10], index: 4, kind: input, shape index: {}]   ;;  %s2408_s5 = inlined_call_operand.vmem [shape: f32[2,8,10], index: 5, kind: input, shape index: {}]   ;;  %s2409_s6 = inlined_call_operand.vmem [shape: f32[2,2,8,16], index: 6, kind: input, shape index: {}]   ;;  %s2410_s7 = inlined_call_operand.vmem [shape: f32[2,2,10,16], index: 7, kind: input, shape index: {}]   ;;  %s2411_s8 = inlined_call_operand.vmem [shape: f32[2,2,1,16], index: 8, kind: input, shape index: {}]   ;;  %s2412_s9 = inlined_call_operand.vmem [shape: f32[2,2,16,16], index: 9, kind: input, shape index: {}]   ;;  %s2413_s10 = inlined_call_operand.vmem [shape: f32[2,2,1,16], index: 10, kind: input, shape index: {}]   ;;  %s2414_s11 = inlined_call_operand.vmem [shape: f32[2,2,10,16], index: 11, kind: input, shape index: {}]   ;;  %s2415_s12 = inlined_call_operand.vmem [shape: f32[2,2,16,16], index: 12, kind: input, shape index: {}]   ;;  %s2416_s13 = inlined_call_operand.vmem [shape: f32[2,2,1,16], index: 13, kind: input, shape index: {}]   ;;  %s2417_s14 = inlined_call_operand.vmem [shape: f32[2,2,16,128], index: 14, kind: input, shape index: {}]   ;;  %s2418_s15 = inlined_call_operand.vmem [shape: f32[2,2,1,128], index: 15, kind: input, shape index: {}]   ;;  %s2419_s16 = inlined_call_operand.hbm [shape: f32[2,8,128], index: 16, kind: output, shape index: {}]  }
   0x1   :  { %2437 = sst [smem:[#allocation22_spill]] %s2403_s0 }
   0x2   :  { %2438 = sst [smem:[#allocation23_spill]] %s2404_s1 }
   0x3   :  { %2439 = sst [smem:[#allocation24_spill]] %s2405_s2 }
   0x4   :  { %2440 = sst [smem:[#allocation25_spill]] %s2406_s3 }
   0x5   :  { %2441 = sst [smem:[#allocation26_spill]] %s2407_s4 }
   0x6   :  { %2442 = sst [smem:[#allocation27_spill]] %s2408_s5 }
   0x7   :  { %2443 = sst [smem:[#allocation28_spill]] %s2409_s6 }
   0x8   :  { %2444 = sst [smem:[#allocation29_spill]] %s2410_s7 }
   0x9   :  { %2445 = sst [smem:[#allocation30_spill]] %s2412_s9 }
   0xa   :  { %2446 = sst [smem:[#allocation31_spill]] %s2413_s10 }
   0xb   :  { %2447 = sst [smem:[#allocation32_spill]] %s2416_s13 }
   0xc   :  { %2448 = sst [smem:[#allocation33_spill]] %s2417_s14 }
   0xd   :  { %2449 = sst [smem:[#allocation34_spill]] %s2418_s15 }
   0xe   :  { %2450 = sst [smem:[#allocation35_spill]] %s2419_s16 }
   0xf   :  { %s2451_s23 = sld [smem:[#allocation22_spill]] }
  0x15   :  { %s22_s10 = sshll.u32 %s2451_s23, 4  ;;  %s23_s10 = int_to_ptr.vmem [resolvable:$true] %s22_s10 }
  0x16   :  { %25 = dma.vmem_to_smem %s23_s10, 32, %s2002_s24, [#allocation2] }
  0x17   :  { %1964 = dma.done.wait [#allocation2], 32 }
  0x18   :  { %1965 = vsyncadd [#allocation2], 4294967264 }
  0x19   :  { %28 = sfence }
  0x1a   :  { %29 = vsyncpa [#allocation5], 0 }
  0x1b   :  { %31 = vsyncpa [#allocation5 + $0x1], 0  ;;  %s2101_s25 = smov 0   ;;  %s2103_s26 = smov 0  }
  0x1c   :  { %s2105_s27 = smov 0   ;;  %s2107_s28 = smov 0  }
  0x1d   :  { %s2109_s29 = smov 0   ;;  %s2111_s30 = smov 0  }
  0x1e   :  { %s2113_s0 = smov 0   ;;  %s2115_s10 = smov 0  }
  0x1f LB: > { %2452 = sst [smem:[#allocation8_spill]] %s1972_s25  ;;  %s1729_s17 = sadd.s32 4294967295, %s2000_s10   ;;  %s2000_s10 = sphi %s2115_s10, %s37_s10   ;;  %s1996_s0 = sphi %s2113_s0, %s2505_s0   ;;  %s1992_s30 = sphi %s2111_s30, %s2504_s30   ;;  %s1988_s29 = sphi %s2109_s29, %s2503_s29   ;;  %s1984_s28 = sphi %s2107_s28, %s2502_s28   ;;  %s1980_s27 = sphi %s2105_s27, %s2501_s27   ;;  %s1976_s26 = sphi %s2103_s26, %s2500_s26   ;;  %s1972_s25 = sphi %s2101_s25, %s2499_s25  }
  0x20   : > { %2453 = sst [smem:[#allocation9_spill]] %s1976_s26  ;;  %s1730_s18 = sadd.s32 4294967294, %s2000_s10  }
  0x21   : > { %2454 = sst [smem:[#allocation10_spill]] %s1980_s27  ;;  %s46_s19 = sadd.s32 1, %s1992_s30 }
  0x22   : > { %2455 = sst [smem:[#allocation11_spill]] %s1984_s28  ;;  %p47_p0 = scmp.ge.s32.totalorder %s46_s19, 2 }
  0x23   : > { %2456 = sst [smem:[#allocation12_spill]] %s1988_s29  ;;  %s49_s20 = sadd.s32 1, %s1996_s0 }
  0x24   : > { %2457 = sst [smem:[#allocation13_spill]] %s1992_s30  ;;  %p482_p1 = scmp.ne.s32.totalorder %s1980_s27, %s1976_s26 }
  0x25   : > { %2458 = sst [smem:[#allocation14_spill]] %s1996_s0  ;;  %p483_p2 = scmp.eq.s32.totalorder %s1729_s17, 3 }
  0x26   : > { %2459 = sst [smem:[#allocation15_spill]] %s2000_s10  ;;  %s2507_s19 = smov (%p47_p0, %s46_s19), 0 }
  0x27   : > { %2460 = sst [smem:[#allocation16_spill]] %s2507_s19  ;;  %s2509_s20 = smov (!%p47_p0, %s49_s20), %s1996_s0 }
  0x28   : > { %p2150_p3 = por %p483_p2, %p482_p1  ;;  %p488_p4 = scmp.ne.s32.totalorder %s1976_s26, %s1972_s25 }
  0x29   : > { %p51_p5 = scmp.ge.s32.totalorder %s2509_s20, 2  ;;  %p489_p6 = scmp.eq.s32.totalorder %s1730_s18, 3 }
  0x2a   : > { %s2461_s21 = scalar_select %p2150_p3, 1, 0 }
  0x2b   : > { %p1733_p7 = scmp.ge.s32.totalorder %s2000_s10, 1  ;;  %p668_p8 = scmp.lt.s32.totalorder %s2000_s10, 5 }
  0x2c   : > { %2462 = sst [smem:[#allocation17_spill]] %s2461_s21  ;;  %s2511_s20 = smov (%p51_p5, %s2509_s20), 0 }
  0x2d   : > { %2463 = sst [smem:[#allocation18_spill]] %s2511_s20  ;;  %p2160_p9 = por %p489_p6, %p488_p4 }
  0x2e   : > { %p669_p10 = pnand %p1733_p7, %p668_p8  ;;  %s469_s23 = ssub.s32 %s1996_s0, %s2511_s20 }
  0x2f   : > { %s2464_s22 = scalar_select %p2160_p9, 1, 0 }
  0x30   : > { %s472_s24 = sadd.s32 1, %s1980_s27  ;;  %p470_p11 = scmp.eq.s32.totalorder %s469_s23, 0 }
  0x31   : > { %2465 = sst [smem:[#allocation19_spill]] %s2464_s22  ;;  %672 = sbr.rel (%p669_p10) target bundleno = 837 (0x345), region = 80 }
  0x32   : > { %s2168_s17 = scalar_select %p470_p11, %s1980_s27, %s472_s24  }
  0x34   : > { %2466 = sst [smem:[#allocation20_spill]] %s2168_s17 }
  0x36   : > { %s2431_s18 = sand.u32 1, %s1976_s26   ;;  %p827_p12 = scmp.lt.s32.totalorder %s1988_s29, 1 }
  0x37   : > { %s1734_s19 = sshll.u32 %s2431_s18, 3  ;;  %p829_p13 = scmp.lt.s32.totalorder %s1984_s28, 1 }
  0x38   : > { %s828_s30 = scalar_select %p827_p12, %s1988_s29, 1 }
  0x39   : > { %s830_s22 = scalar_select %p829_p13, %s1984_s28, 1 }
  0x3a   : > { %s1736_s25 = sshll.u32 %s828_s30, 2  ;;  %s1745_s20 = sshll.u32 %s828_s30, 3 }
  0x3b   : > { %s1735_s0 = sshll.u32 %s830_s22, 1  ;;  %s1744_s23 = sshll.u32 %s830_s22, 3 }
  0x3c   : > { %s833_s24 = sadd.s32 %s1736_s25, %s1735_s0  ;;  %s2467_s4 = sld [smem:[#allocation26_spill]] }
  0x3d   : > { %s1737_s16 = sshll.u32 %s833_s24, 3  ;;  %s2468_s5 = sld [smem:[#allocation27_spill]] }
  0x3e   : > { %s2470_s1 = sld [smem:[#allocation23_spill]]  ;;  %s2234_s0 = scalar_lea.vmem %s2415_s12, %s1737_s16 }
  0x3f   : > { %s2471_s2 = sld [smem:[#allocation24_spill]] }
  0x40   : > { %s2472_s3 = sld [smem:[#allocation25_spill]] }
  0x41   : > { %s2473_s7 = sld [smem:[#allocation29_spill]] }
  0x42   : > { %s2180_s10 = scalar_lea.vmem %s2467_s4, %s1744_s23  ;;  %s1746_s23 = sshll.u32 %s828_s30, 1 }
  0x43   : > { %s2185_s14 = scalar_lea.vmem %s2468_s5, %s1745_s20  ;;  %s2202_s24 = sadd.s32 %s1746_s23, %s830_s22 }
  0x44   : > { %2469 = sst [smem:[#allocation21_spill]] %s2185_s14  ;;  %s2190_s29 = scalar_lea.vmem %s2470_s1, %s1737_s16 }
  0x45   : > { %s2195_s25 = scalar_lea.vmem %s2471_s2, %s1737_s16  ;;  %s1747_s13 = sshll.u32 %s2202_s24, 3 }
  0x46   : > { %s2200_s17 = scalar_lea.vmem %s2472_s3, %s1737_s16  ;;  %s2474_s6 = sld [smem:[#allocation28_spill]] }
  0x47   : > { %s878_s26 = scalar_lea.vmem %s2473_s7, %s1737_s16  ;;  %s2475_s9 = sld [smem:[#allocation30_spill]] }
  0x48   : > { %s2229_s7 = scalar_lea.vmem %s2414_s11, %s1737_s16  ;;  %s2477_s18 = sld [smem:[#allocation32_spill]] }
  0x49   : > { %s2479_s20 = sld [smem:[#allocation34_spill]]  ;;  %s2249_s5 = scalar_lea.vmem [#allocation4], %s1734_s19 }
  0x4a   : > { %s2480_s3 = sld [smem:[#allocation11_spill]] }
  0x4c   : > { %s2215_s30 = scalar_lea.vmem %s2474_s6, %s1747_s13 }
  0x4d   : > { %s2220_s15 = scalar_lea.vmem %s2475_s9, %s1737_s16  ;;  %s2478_s9 = sld [smem:[#allocation33_spill]] }
  0x4e   : > { %s926_s22 = scalar_lea.vmem %s2477_s18, %s2202_s24 }
  0x4f   : > { %s942_s4 = scalar_lea.vmem %s2479_s20, %s2202_s24 }
  0x50   : > { %p1767_p0 = scmp.ne.s32.totalorder %s2480_s3, 0 }
  0x52   : > { %946 = sbr.rel (%p1767_p0) target bundleno = 89 (0x59), region = 84 }
  0x53   : > { %s2243_s14 = scalar_lea.vmem %s2478_s9, %s1737_s16 }
  0x57   : > { %v2003_v0 = vmov -3e+38  }
  0x58   : > { %947 = vst [vmem:[%s2249_s5] sm:$0xff] %v2003_v0 }
  0x59 PF: > { %s2481_s28 = sld [smem:[#allocation11_spill]] }
  0x5a   : > { %s2482_s18 = sld [smem:[#allocation12_spill]] }
  0x5f   : > { %s948_s21 = sshra.s32 %s2481_s28, 7  ;;  %s953_s6 = sand.u32 127, %s2481_s28 }
  0x60   : > { %s950_s9 = sadd.s32 %s2482_s18, %s948_s21 }
  0x61   : > { %s1768_s16 = sshll.u32 %s950_s9, 7 }
  0x62   : > { %s954_s13 = sadd.s32 %s1768_s16, %s953_s6 }
  0x63   : > { %s955_s27 = sld [smem:[#allocation3 + %s954_s13]] }
  0x69   : > { %p1769_p1 = scmp.le.s32.totalorder %s955_s27, 0 }
  0x6b   : > { %959 = sbr.rel (%p1769_p1) target bundleno = 815 (0x32f), region = 88 }
  0x70   : > { %v982_v1 = vld [vmem:[%s878_s26 + $0x8] sm:$0x3]  ;;  %vm2436_vm0 = vcmask 1041408   ;;  %v981_v2 = vld [vmem:[%s878_s26] sm:$0xff]  ;;  %vm983_vm1 = vcmask 80896   ;;  %v2004_v6 = vmov 0   ;;  %v966_v13 = vlaneseq }
  0x71   : > { %1772 = vmatpush.msk.msra.mxu0 %vm2436_vm0, %v982_v1  ;;  %v980_v3 = vld [vmem:[%s2180_s10] sm:$0xff]  ;;  %1870 = vset.pattern.permute.xlu0 %v2004_v6  ;;  %v963_v7 = vld [vmem:[%s2195_s25 + $0x8] sm:$0xf]  ;;  %vm1012_vm2 = vcmask 64512   ;;  %v2005_v12 = vmov 1   ;;  %v2006_v19 = vmov 0.0   ;;  %s2483_s10 = scalar_lea.vmem %s2411_s8, %s2202_s24 }
  0x72   : > { %v962_v4 = vld [vmem:[%s2195_s25] sm:$0xff]  ;;  %1871 = vset.pattern.permute.xlu1 %v2004_v6  ;;  %1872 = vset.pattern.permute.xlu2 %v2004_v6  ;;  %v965_v8 = vld [vmem:[%s2200_s17 + $0x8] sm:$0xf]  ;;  %v967_v14 = vand.u32 127, %v966_v13  ;;  %v2007_v23 = vmov 3   ;;  %v2008_v25 = vmov 2  }
  0x73   : > { %v964_v5 = vld [vmem:[%s2200_s17] sm:$0xff]  ;;  %1006 = vmatpush.msra.mxu0 %v981_v2  ;;  %969 = vperm.xlu0 %1870, %v962_v4   ;;  %v961_v11 = vld [vmem:[%s2190_s29 + $0x8] sm:$0xf]  ;;  %v2009_v27 = vmov 6   ;;  %v2010_v28 = vmov 4   ;;  %v2011_v29 = vmov 7  }
  0x74   : > { %1773 = vmatmul.msk.f32.vlgmr.msra.gmra.mxu0 %vm983_vm1, %v980_v3  ;;  %1116 = vperm.xlu1 %1871, %v964_v5   ;;  %v1011_v9 = vld [vmem:[%s2215_s30] sm:$0xff]  ;;  %v2012_v30 = vmov 5   ;;  %v1080_v31 = vld [vmem:[%s2220_s15 + $0x8] sm:$0xff]  ;;  %vm1085_vm7 = vcmask 130048   ;;  %s2484_s17 = sld [smem:[#allocation31_spill]] }
  0x75   : > { %v960_v10 = vld [vmem:[%s2190_s29] sm:$0xff]  ;;  %1063 = vmatpush.msra.mxu2 %v1011_v9  ;;  %1106 = vmatpush.msra.mxu3 %v1080_v31  ;;  %v1295_v51 = vld [vmem:[%s2229_s7 + $0x8] sm:$0x3] }
  0x76   : > { %1776 = vmatmul.msk.f32.vlgmr.msra.gmra.mxu2 %vm1012_vm2, %v960_v10  ;;  %v1079_v32 = vld [vmem:[%s2220_s15] sm:$0xff]  ;;  %v1297_v52 = vld [vmem:[%s2234_s0 + $0x8] sm:$0xff] }
  0x77   : > { %1107 = vmatpush.msra.mxu3 %v1079_v32  ;;  %v1888_v34 = vld [vmem:[%s2483_s10] ss:$0 sm:$0xff]  ;;  %1315 = vmatpush.msrb.mxu0 %v1297_v52 }
  0x78   : > { %v1294_v53 = vld [vmem:[%s2229_s7] sm:$0xff]  ;;  %s2486_s7 = sld [smem:[#allocation21_spill]] }
  0x79   : > { %v1296_v54 = vld [vmem:[%s2234_s0] sm:$0xff] }
  0x7a   : > { %1316 = vmatpush.msrb.mxu0 %v1296_v54  ;;  %s2485_s26 = scalar_lea.vmem %s2484_s17, %s2202_s24  ;;  %v1353_v13 = vld [vmem:[%s2243_s14] sm:$0xff] }
  0x7b   : > { %972 = vperm.xlu0 %1870, %v963_v7   ;;  %v1889_v61 = vld [vmem:[%s2485_s26] ss:$0 sm:$0xff] }
  0x7c   : > { %1119 = vperm.xlu1 %1871, %v965_v8  }
  0x7e   : > { %1777 = vmatmul.msk.f32.gmra.mxu2 %vm1012_vm2, %v961_v11  ;;  %v1293_v11 = vld [vmem:[%s2486_s7] sm:$0xff] }
  0x83   : > { %1873 = vset.pattern.permute.xlu0 %v2005_v12 }
  0x84   : > { %1874 = vset.pattern.permute.xlu1 %v2005_v12  ;;  %v1354_v12 = vld [vmem:[%s2243_s14 + $0x8] sm:$0xff] }
  0x85   : > { %1376 = vmatpush.msrb.mxu2 %v1354_v12 }
  0x87   : > { %1377 = vmatpush.msrb.mxu2 %v1353_v13 }
  0xe5   : > { %v970_v17 = vpop.permute.xlu0 %969 }
  0xe6   : > { %v1117_v15 = vpop.permute.xlu1 %1116  ;;  %vm974_vm4 = vcmp.eq.s32.totalorder %v967_v14, %v970_v17 }
  0xe7   : > { %vm1121_vm3 = vcmp.eq.s32.totalorder %v967_v14, %v1117_v15  ;;  %v1770_v20 = vsel %vm974_vm4, 1.0, %v2006_v19 }
  0xe8   : > { %v1123_v16 = vsel %vm1121_vm3, 1, %v2004_v6 }
  0xe9   : > { %1126 = vperm.xlu2 %1872, %v1123_v16   ;;  %1146 = vperm.xlu0 %1873, %v1123_v16  }
  0xed   : > { %v973_v24 = vpop.permute.xlu0 %972 }
  0xee   : > { %v1120_v18 = vpop.permute.xlu1 %1119  ;;  %vm975_vm6 = vcmp.eq.s32.totalorder %v967_v14, %v973_v24 }
  0xef   : > { %vm1122_vm5 = vcmp.eq.s32.totalorder %v967_v14, %v1120_v18  ;;  %v1771_v26 = vsel %vm975_vm6, 1.0, %v2006_v19 }
  0xf0   : > { %v1124_v21 = vsel %vm1122_vm5, 1, %v2004_v6 }
  0xf1   : > { %v1008_v22 = vpop.f32.mrf.mxu0  ;;  %1149 = vperm.xlu1 %1874, %v1124_v21   ;;  %1129 = vperm.xlu2 %1872, %v1124_v21  }
  0xf2   : > { %1034 = vmatpush.msra.mxu1 %v1008_v22  ;;  %1878 = vset.pattern.permute.xlu0 %v2007_v23 }
  0xf3   : > { %1774 = vmatmul.msk.f32.vlgmr.msra.gmra.mxu1 %vm1012_vm2, %v1770_v20  ;;  %1187 = vperm.xlu0 %1878, %v1124_v21  }
  0xf4   : > { %1781 = vmatpush.msk.msrb.mxu1 %vm2436_vm0, %v1295_v51 }
  0xf6   : > { %1342 = vmatpush.msrb.mxu1 %v1294_v53 }
  0xf9   : > { %1876 = vset.pattern.permute.xlu1 %v2008_v25  ;;  %1875 = vset.pattern.permute.xlu2 %v2008_v25  ;;  %v1065_v33 = vpop.f32.mrf.mxu2 }
  0xfa   : > { %1168 = vperm.xlu1 %1876, %v1124_v21   ;;  %1165 = vperm.xlu2 %1875, %v1123_v16  }
  0xfb   : > { %1775 = vmatmul.msk.f32.gmra.mxu1 %vm1012_vm2, %v1771_v26  ;;  %1883 = vset.pattern.permute.xlu0 %v2009_v27 }
  0xfc   : > { %1241 = vperm.xlu0 %1883, %v1123_v16  }
 0x101   : > { %v1068_v39 = vpop.f32.mrf.mxu2 }
 0x102   : > { %1879 = vset.pattern.permute.xlu1 %v2010_v28  ;;  %1877 = vset.pattern.permute.xlu2 %v2007_v23 }
 0x103   : > { %1203 = vperm.xlu1 %1879, %v1123_v16   ;;  %1184 = vperm.xlu2 %1877, %v1123_v16  }
 0x104   : > { %1887 = vset.pattern.permute.xlu0 %v2011_v29  ;;  %1782 = vmatmul.msk.f32.vlgmr.msrb.gmra.mxu1 %vm983_vm1, %v1293_v11 }
 0x10b   : > { %1881 = vset.pattern.permute.xlu1 %v2012_v30  ;;  %1880 = vset.pattern.permute.xlu2 %v2010_v28 }
 0x10c   : > { %1222 = vperm.xlu1 %1881, %v1123_v16   ;;  %1206 = vperm.xlu2 %1880, %v1124_v21  }
 0x114   : > { %1884 = vset.pattern.permute.xlu1 %v2009_v27  ;;  %1882 = vset.pattern.permute.xlu2 %v2012_v30 }
 0x115   : > { %1244 = vperm.xlu1 %1884, %v1124_v21   ;;  %1225 = vperm.xlu2 %1882, %v1124_v21  }
 0x11d   : > { %1886 = vset.pattern.permute.xlu1 %v2011_v29  ;;  %1885 = vset.pattern.permute.xlu2 %v2011_v29 }
 0x11e   : > { %1263 = vperm.xlu1 %1886, %v1124_v21   ;;  %1260 = vperm.xlu2 %1885, %v1123_v16  }
 0x143   : > { %v1127_v44 = vpop.permute.xlu2 %1126 }
 0x144   : > { %vm1131_vm8 = vcmp.eq.s32.totalorder %v1127_v44, 1 }
 0x14b   : > { %v2279_v45 = vpop.permute.xlu2 %1129 }
 0x14c   : > { %vm1132_vm9 = vcmp.eq.s32.totalorder %v2279_v45, 1 }
 0x154   : > { %v1166_v47 = vpop.permute.xlu2 %1165 }
 0x155   : > { %vm1170_vm10 = vcmp.eq.s32.totalorder %v1166_v47, 1 }
 0x15b   : > { %v1147_v56 = vpop.permute.xlu0 %1146 }
 0x15c   : > { %vm1151_vm15 = vcmp.eq.s32.totalorder %v1147_v56, 1 }
 0x15d   : > { %v1185_v49 = vpop.permute.xlu2 %1184 }
 0x15e   : > { %vm1189_vm13 = vcmp.eq.s32.totalorder %v1185_v49, 1 }
 0x163   : > { %v2281_v46 = vpop.permute.xlu1 %1149 }
 0x164   : > { %vm1152_vm11 = vcmp.eq.s32.totalorder %v2281_v46, 1 }
 0x165   : > { %v1188_v59 = vpop.permute.xlu0 %1187 }
 0x166   : > { %v2290_v55 = vpop.permute.xlu2 %1206  ;;  %vm2487_vm1 = vcmp.eq.s32.totalorder %v1188_v59, 1 }
 0x167   : > { %vm1209_vm6 = vcmp.eq.s32.totalorder %v2290_v55, 1 }
 0x16c   : > { %v2283_v48 = vpop.permute.xlu1 %1168 }
 0x16d   : > { %vm1171_vm12 = vcmp.eq.s32.totalorder %v2283_v48, 1 }
 0x16e   : > { %v1242_v0 = vpop.permute.xlu0 %1241 }
 0x16f   : > { %v2292_v58 = vpop.permute.xlu2 %1225  ;;  %vm1246_vm5 = vcmp.eq.s32.totalorder %v1242_v0, 1 }
 0x170   : > { %v1036_v35 = vpop.f32.mrf.mxu1  ;;  %vm1228_vm0 = vcmp.eq.s32.totalorder %v2292_v58, 1 }
 0x171   : > { %v1066_v36 = vadd.f32 %v1065_v33, %v1036_v35 }
 0x173   : > { %v1075_v37 = vadd.f32 %v1888_v34, %v1066_v36 }
 0x175   : > { %v1077_v38 = vmax.f32 %v1075_v37, 0.0  ;;  %v1204_v50 = vpop.permute.xlu1 %1203 }
 0x176   : > { %vm1208_vm14 = vcmp.eq.s32.totalorder %v1204_v50, 1 }
 0x177   : > { %1778 = vmatmul.msk.f32.vlgmr.msra.gmra.mxu3 %vm1085_vm7, %v1077_v38 }
 0x178   : > { %v1039_v40 = vpop.f32.mrf.mxu1  ;;  %v1261_v63 = vpop.permute.xlu2 %1260 }
 0x179   : > { %v1069_v41 = vadd.f32 %v1068_v39, %v1039_v40  ;;  %vm1265_vm3 = vcmp.eq.s32.totalorder %v1261_v63, 1 }
 0x17b   : > { %v1076_v42 = vadd.f32 %v1888_v34, %v1069_v41 }
 0x17d   : > { %v1078_v43 = vmax.f32 %v1076_v42, 0.0 }
 0x17e   : > { %v1223_v57 = vpop.permute.xlu1 %1222 }
 0x17f   : > { %1779 = vmatmul.msk.f32.gmra.mxu3 %vm1085_vm7, %v1078_v43  ;;  %vm1227_vm4 = vcmp.eq.s32.totalorder %v1223_v57, 1 }
 0x187   : > { %v2294_v60 = vpop.permute.xlu1 %1244 }
 0x188   : > { %vm1247_vm2 = vcmp.eq.s32.totalorder %v2294_v60, 1 }
 0x190   : > { %v1264_v6 = vpop.permute.xlu1 %1263 }
 0x1fa   : > { %v1109_v62 = vpop.f32.mrf.mxu3 }
 0x1fb   : > { %v1110_v1 = vadd.f32 %v1889_v61, %v1109_v62 }
 0x1fd   : > { %v1133_v2 = vsel %vm1131_vm8, %v1110_v1, -3e+38  ;;  %v1153_v3 = vsel %vm1151_vm15, %v1110_v1, -3e+38  ;;  %v1172_v4 = vsel %vm1170_vm10, %v1110_v1, -3e+38 }
 0x1fe   : > { %v1191_v5 = vsel %vm1189_vm13, %v1110_v1, -3e+38  ;;  %v1210_v7 = vsel %vm1208_vm14, %v1110_v1, -3e+38  ;;  %v1229_v8 = vsel %vm1227_vm4, %v1110_v1, -3e+38 }
 0x1ff   : > { %v1248_v9 = vsel %vm1246_vm5, %v1110_v1, -3e+38  ;;  %v1267_v10 = vsel %vm1265_vm3, %v1110_v1, -3e+38  ;;  %v1135_v15 = vsel %vm1085_vm7, %v1133_v2, -inf  ;;  %vm1136_vm8 = vcmask 125952  }
 0x200   : > { %vm1266_vm10 = vcmp.eq.s32.totalorder %v1264_v6, 1  ;;  %v1155_v17 = vsel %vm1085_vm7, %v1153_v3, -inf  ;;  %v1174_v18 = vsel %vm1085_vm7, %v1172_v4, -inf  ;;  %v1193_v19 = vsel %vm1085_vm7, %v1191_v5, -inf }
 0x201   : > { %v1212_v20 = vsel %vm1085_vm7, %v1210_v7, -inf  ;;  %v1231_v21 = vsel %vm1085_vm7, %v1229_v8, -inf  ;;  %v1250_v22 = vsel %vm1085_vm7, %v1248_v9, -inf  ;;  %v1269_v23 = vsel %vm1085_vm7, %v1267_v10, -inf }
 0x202   : > { %v1112_v14 = vpop.f32.mrf.mxu3  ;;  %vm2488_vm13 = vcmask 1041408   ;;  %vm1287_vm14 = vcmask 1045504   ;;  %vm1289_vm15 = vcmask 1046528  }
 0x203   : > { %v1113_v16 = vadd.f32 %v1889_v61, %v1112_v14 }
 0x205   : > { %v1134_v24 = vsel %vm1132_vm9, %v1113_v16, -3e+38  ;;  %v1154_v25 = vsel %vm1152_vm11, %v1113_v16, -3e+38  ;;  %v1173_v26 = vsel %vm1171_vm12, %v1113_v16, -3e+38 }
 0x206   : > { %v1137_v27 = vsel %vm1136_vm8, %v1134_v24, -inf  ;;  %v1156_v28 = vsel %vm1136_vm8, %v1154_v25, -inf  ;;  %v1175_v29 = vsel %vm1136_vm8, %v1173_v26, -inf  ;;  %v1192_v30 = vsel %vm2487_vm1, %v1113_v16, -3e+38 }
 0x207   : > { %v1138_v31 = vmax.f32 %v1135_v15, %v1137_v27  ;;  %v1157_v32 = vmax.f32 %v1155_v17, %v1156_v28  ;;  %v1176_v33 = vmax.f32 %v1174_v18, %v1175_v29  ;;  %v1194_v34 = vsel %vm1136_vm8, %v1192_v30, -inf }
 0x208   : > { %v1195_v35 = vmax.f32 %v1193_v19, %v1194_v34  ;;  %v1211_v36 = vsel %vm1209_vm6, %v1113_v16, -3e+38  ;;  %v1230_v37 = vsel %vm1228_vm0, %v1113_v16, -3e+38  ;;  %v1249_v38 = vsel %vm1247_vm2, %v1113_v16, -3e+38 }
 0x209   : > { %v1139_v39 = vrot.slane %v1138_v31, 4  ;;  %v1158_v40 = vrot.slane %v1157_v32, 4  ;;  %v1177_v41 = vrot.slane %v1176_v33, 4  ;;  %v1213_v42 = vsel %vm1136_vm8, %v1211_v36, -inf }
 0x20a   : > { %v1196_v43 = vrot.slane %v1195_v35, 4  ;;  %v1214_v44 = vmax.f32 %v1212_v20, %v1213_v42  ;;  %v1232_v45 = vsel %vm1136_vm8, %v1230_v37, -inf  ;;  %v1251_v46 = vsel %vm1136_vm8, %v1249_v38, -inf }
 0x20b   : > { %vm1278_vm9 = vcmask 1040384   ;;  %v1140_v47 = vmax.f32 %v1138_v31, %v1139_v39  ;;  %v1159_v48 = vmax.f32 %v1157_v32, %v1158_v40  ;;  %v1178_v49 = vmax.f32 %v1176_v33, %v1177_v41  ;;  %v1344_v40 = vpop.f32.mrf.mxu1  ;;  %v1890_v41 = vld [vmem:[%s926_s22] ss:$0 sm:$0xff] }
 0x20c   : > { %v1233_v50 = vmax.f32 %v1231_v21, %v1232_v45  ;;  %v1197_v51 = vmax.f32 %v1195_v35, %v1196_v43  ;;  %v1215_v52 = vrot.slane %v1214_v44, 4  ;;  %v1252_v53 = vmax.f32 %v1250_v22, %v1251_v46  ;;  %v1891_v46 = vld [vmem:[%s942_s4] ss:$0 sm:$0xff] }
 0x20d   : > { %v1268_v54 = vsel %vm1266_vm10, %v1113_v16, -3e+38  ;;  %vm1281_vm0 = vcmask 1042432   ;;  %v1141_v55 = vrot.slane %v1140_v47, 2  ;;  %v1160_v56 = vrot.slane %v1159_v48, 2 }
 0x20e   : > { %v1179_v57 = vrot.slane %v1178_v49, 2  ;;  %v1234_v58 = vrot.slane %v1233_v50, 4  ;;  %v1198_v59 = vrot.slane %v1197_v51, 2  ;;  %v1216_v60 = vmax.f32 %v1214_v44, %v1215_v52 }
 0x20f   : > { %v1253_v61 = vrot.slane %v1252_v53, 4  ;;  %v1270_v62 = vsel %vm1136_vm8, %v1268_v54, -inf  ;;  %v1142_v63 = vmax.f32 %v1140_v47, %v1141_v55  ;;  %v1161_v0 = vmax.f32 %v1159_v48, %v1160_v56  ;;  %v1382_v48 = vld [vmem:[%s2249_s5] sm:$0xff] }
 0x210   : > { %v1180_v1 = vmax.f32 %v1178_v49, %v1179_v57  ;;  %v1235_v2 = vmax.f32 %v1233_v50, %v1234_v58  ;;  %v1199_v3 = vmax.f32 %v1197_v51, %v1198_v59  ;;  %v1217_v4 = vrot.slane %v1216_v60, 2 }
 0x211   : > { %v1254_v5 = vmax.f32 %v1252_v53, %v1253_v61  ;;  %v1271_v7 = vmax.f32 %v1269_v23, %v1270_v62  ;;  %v1143_v6 = vrot.slane %v1142_v63, 1  ;;  %v1162_v8 = vrot.slane %v1161_v0, 1 }
 0x212   : > { %v1181_v9 = vrot.slane %v1180_v1, 1  ;;  %v1236_v10 = vrot.slane %v1235_v2, 2  ;;  %v1200_v11 = vrot.slane %v1199_v3, 1  ;;  %v1218_v12 = vmax.f32 %v1216_v60, %v1217_v4 }
 0x213   : > { %v1255_v13 = vrot.slane %v1254_v5, 2  ;;  %v1272_v14 = vrot.slane %v1271_v7, 4  ;;  %v1144_v15 = vmax.f32 %v1142_v63, %v1143_v6  ;;  %v1163_v16 = vmax.f32 %v1161_v0, %v1162_v8 }
 0x214   : > { %v1182_v17 = vmax.f32 %v1180_v1, %v1181_v9  ;;  %v1237_v18 = vmax.f32 %v1235_v2, %v1236_v10  ;;  %v1219_v19 = vrot.slane %v1218_v12, 1  ;;  %vm1283_vm11 = vcmask 1043456  }
 0x215   : > { %v1256_v20 = vmax.f32 %v1254_v5, %v1255_v13  ;;  %v1273_v21 = vmax.f32 %v1271_v7, %v1272_v14  ;;  %v1201_v22 = vmax.f32 %v1199_v3, %v1200_v11  ;;  %v1279_v23 = vsel %vm1278_vm9, %v1144_v15, %v1163_v16 }
 0x216   : > { %v1238_v24 = vrot.slane %v1237_v18, 1  ;;  %vm1285_vm12 = vcmask 1044480   ;;  %v1220_v25 = vmax.f32 %v1218_v12, %v1219_v19  ;;  %v1280_v28 = vsel %vm2488_vm13, %v1279_v23, %v1182_v17 }
 0x217   : > { %v1257_v26 = vrot.slane %v1256_v20, 1  ;;  %v1274_v27 = vrot.slane %v1273_v21, 2  ;;  %v1282_v30 = vsel %vm1281_vm0, %v1280_v28, %v1201_v22 }
 0x218   : > { %v1239_v29 = vmax.f32 %v1237_v18, %v1238_v24  ;;  %v1284_v32 = vsel %vm1283_vm11, %v1282_v30, %v1220_v25 }
 0x219   : > { %v1275_v31 = vmax.f32 %v1273_v21, %v1274_v27  ;;  %v1258_v33 = vmax.f32 %v1256_v20, %v1257_v26 }
 0x21a   : > { %v1286_v34 = vsel %vm1285_vm12, %v1284_v32, %v1239_v29 }
 0x21b   : > { %v1276_v35 = vrot.slane %v1275_v31, 1  ;;  %v1288_v36 = vsel %vm1287_vm14, %v1286_v34, %v1258_v33 }
 0x21d   : > { %v1277_v37 = vmax.f32 %v1275_v31, %v1276_v35 }
 0x21f   : > { %v1290_v38 = vsel %vm1289_vm15, %v1288_v36, %v1277_v37 }
 0x220   : > { %vm1291_vm2 = vcmp.gt.f32.partialorder %v1290_v38, -1e+38 }
 0x221   : > { %v1292_v39 = vsel %vm1291_vm2, %v1290_v38, 0.0 }
 0x222   : > { %1780 = vmatmul.msk.f32.vlgmr.msrb.gmra.mxu0 %vm1085_vm7, %v1292_v39 }
 0x29f   : > { %v1318_v42 = vpop.f32.mrf.mxu0 }
 0x2a0   : > { %v1345_v43 = vadd.f32 %v1344_v40, %v1318_v42 }
 0x2a2   : > { %v1351_v44 = vadd.f32 %v1890_v41, %v1345_v43 }
 0x2a4   : > { %v1352_v45 = vmax.f32 %v1351_v44, 0.0 }
 0x2a6   : > { %1783 = vmatmul.msk.f32.vlgmr.msrb.gmra.mxu2 %vm1085_vm7, %v1352_v45 }
 0x329   : > { %v1379_v47 = vpop.f32.mrf.mxu2 }
 0x32a   : > { %v1380_v49 = vadd.f32 %v1891_v46, %v1379_v47 }
 0x32c   : > { %v1383_v50 = vmax.f32 %v1382_v48, %v1380_v49 }
 0x32e   : > { %1384 = vst [vmem:[%s2249_s5] sm:$0xff] %v1383_v50 }
 0x32f PF: > { %s2491_s2 = sld [smem:[#allocation12_spill]]  ;;  %s1398_s16 = sshll.u32 %s2249_s5, 4  ;;  %s1399_s16 = int_to_ptr.vmem [resolvable:$true] %s1398_s16 }
 0x330   : > { %s2492_s22 = sld [smem:[#allocation9_spill]] }
 0x331   : > { %s2494_s6 = sld [smem:[#allocation35_spill]] }
 0x335   : > { %s1785_s28 = sshll.u32 %s2491_s2, 3 }
 0x336   : > { %s2495_s24 = sand.u32 1, %s2492_s22  }
 0x337   : > { %s1396_s9 = scalar_lea.hbm %s2494_s6, %s1785_s28  ;;  %s1386_s4 = scalar_lea.sflag [#allocation5], %s2495_s24 }
 0x338   : > { %s1400_s13 = sshll.u32 %s1396_s9, 4  ;;  %s1924_s19 = scalar_lea.hbm %s2494_s6, 16  ;;  %s1401_s13 = int_to_ptr.hbm [resolvable:$true] %s1400_s13 }
 0x339   : > { %s1918_s27 = sshra.s32 %s1401_s13, 4  ;;  %s1919_s27 = int_to_ptr.hbm [resolvable:$true] %s1918_s27 }
 0x33a   : > { %s1920_s3 = scalar_lea.hbm %s1919_s27, 8  ;;  %p1925_p6 = scmp.lt.s32.totalorder %s1919_s27, %s2494_s6 }
 0x33b   : > { %p1921_p2 = scmp.ne.s32.totalorder %s1919_s27, %s1920_s3  ;;  %p1926_p7 = scmp.lt.s32.totalorder %s1924_s19, %s1920_s3 }
 0x33d   : > { %p1922_p4 = pnand %p1921_p2, %p2150_p3  ;;  %p1927_p8 = por %p1926_p7, %p1925_p6 }
 0x33f   : > { %p1923_p5 = pneg %p1922_p4 }
 0x341   : > { %p1928_p10 = pnand %p1927_p8, %p1923_p5 }
 0x343   : > { %1931 = shalt.err (!%p1928_p10)
}
 0x344   : > { %1788 = dma.vmem_to_hbm [thread:$0]  (%p2150_p3), %s1399_s16, 128, %s1401_s13, %s1386_s4  }
 0x345 PF: > { %s2496_s5 = sld [smem:[#allocation15_spill]] }
 0x346   : > { %s2497_s26 = sld [smem:[#allocation8_spill]] }
 0x34b   : > { %p1794_p11 = scmp.ge.s32.totalorder %s2496_s5, 2 }
 0x34c   : > { %s1412_s14 = sand.u32 1, %s2497_s26  }
 0x34d   : > { %p1791_p12 = pnand %p1794_p11, %p2160_p9  ;;  %s1413_s30 = scalar_lea.sflag [#allocation5], %s1412_s14 }
 0x34f   : > { %p1792_p13 = pneg %p1791_p12 }
 0x351   : > { %1967 = dma.done.wait (%p1792_p13), %s1413_s30, 128  }
 0x352   : > { %1969 = vsyncadd (%p1792_p13), %s1413_s30, 4294967168  ;;  %s37_s10 = sadd.s32 1, %s2496_s5   ;;  %s2499_s25 = sld [smem:[#allocation9_spill]] }
 0x353   : > { %p34_p0 = scmp.ge.s32.totalorder %s37_s10, 6   ;;  %s2500_s26 = sld [smem:[#allocation10_spill]] }
 0x354   : > { %s2501_s27 = sld [smem:[#allocation20_spill]] }
 0x355   : > { %s2502_s28 = sld [smem:[#allocation13_spill]]  ;;  %36 = sbr.rel (!%p34_p0) target bundleno = 31 (0x1f), region = 165 }
 0x356   : > { %s2503_s29 = sld [smem:[#allocation14_spill]] }
 0x357   : > { %s2504_s30 = sld [smem:[#allocation16_spill]] }
 0x358   : > { %s2505_s0 = sld [smem:[#allocation18_spill]] }
 0x35a   :  { %1419 = vsyncpa [#allocation5], 1 }
 0x35b   :  { %1421 = vsyncpa [#allocation5 + $0x1], 1 }

</bundles_post_ra>
